<compile_context>
chip_gen: v5e
topology: v5e:2x2
jax: 0.10.0
libtpu: 0.0.40
codegen_flags: <defaults>
</compile_context>

<pallas_src>
import jax
import jax.numpy as jnp
from jax import lax
from jax.experimental import pallas as pl
from jax.experimental.pallas import tpu as pltpu

LANE = 128


def _round_up(n, m):
    return ((n + m - 1) // m) * m


def dense_net_kernel(x_ref, w1_ref, b1_ref, w2_ref, b2_ref, w3t_ref, b3_ref, o_ref):
    # Streamed f32 activations -> bf16 for the MXU (VPU cast hides under MXU work).
    xb = x_ref[...].astype(jnp.bfloat16)

    # Layer 1: Linear(in -> h1) + ReLU (bf16 MXU operands, f32 accumulate/epilogue).
    h = jnp.dot(xb, w1_ref[...], preferred_element_type=jnp.float32)
    h = jnp.maximum(h + b1_ref[...], 0.0)
    # TODO(synk): nn.Dropout(p=0.3) is identity in eval/inference mode; train-mode
    # dropout (pltpu.prng_seed + pltpu.prng_random_bits mask, scale 1/(1-p)) not implemented.

    # Layer 2: Linear(h1 -> h2) + ReLU.
    h = jnp.dot(h.astype(jnp.bfloat16), w2_ref[...], preferred_element_type=jnp.float32)
    h = jnp.maximum(h + b2_ref[...], 0.0)

    # Output layer computed transposed: y_t = w3t @ h^T -> (out_rows, tb).
    # NT contraction (both operands contract their last dim) is MXU-native and
    # keeps the batch dimension on lanes, so the store is lane-dense.
    y_t = lax.dot_general(
        w3t_ref[...], h.astype(jnp.bfloat16),
        dimension_numbers=(((1,), (1,)), ((), ())),
        preferred_element_type=jnp.float32)

    out_size = o_ref.shape[0]
    y = jax.nn.sigmoid(y_t[:out_size, :] + b3_ref[...])
    o_ref[...] = y.astype(o_ref.dtype)


def prepare_params(params):
    """One-time hoisted prep: bf16 casts, final-layer transpose + sublane padding."""
    w3 = params["w3"].astype(jnp.bfloat16)                  # (hidden_last, out_size)
    out_size = w3.shape[1]
    out_rows = _round_up(max(out_size, 8), 8)               # sublane-aligned rows
    w3t = jnp.zeros((out_rows, w3.shape[0]), jnp.bfloat16).at[:out_size, :].set(w3.T)
    return {
        "w1": params["w1"].astype(jnp.bfloat16),
        "b1": params["b1"].astype(jnp.float32).reshape(1, -1),
        "w2": params["w2"].astype(jnp.bfloat16),
        "b2": params["b2"].astype(jnp.float32).reshape(1, -1),
        "w3t": w3t,                                          # (out_rows, hidden_last)
        "b3": params["b3"].astype(jnp.float32).reshape(-1, 1),  # (out_size, 1)
    }


def _select_batch_tile(batch, batch_tile):
    # Small batches: single grid step, every block equals the full batch extent.
    if batch <= 256:
        return batch
    # Large batches: tiles are multiples of 128 (lane-dense (out, tb) output blocks,
    # bf16-friendly sublane packing) and the grid has >= 2 steps for megacore.
    half = _round_up(pl.cdiv(batch, 2), LANE)
    tb = min(max(batch_tile, LANE), half)
    return _round_up(tb, LANE)


def dense_net_forward(x, prepared, *, batch_tile=2048):
    """x: (B, ...) float32 (flattened to (B, input_size)); prepared: prepare_params()."""
    x = x.reshape(x.shape[0], -1)                            # nn.Flatten
    B, in_size = x.shape
    w1, b1 = prepared["w1"], prepared["b1"]
    w2, b2 = prepared["w2"], prepared["b2"]
    w3t, b3 = prepared["w3t"], prepared["b3"]
    out_size = b3.shape[0]

    tb = _select_batch_tile(B, batch_tile)
    grid = (pl.cdiv(B, tb),)                                 # ragged tail handled by Pallas

    cp_kwargs = dict(dimension_semantics=("parallel",))
    if tb > 2048:
        # Larger tiles exceed the 32 MiB default scoped-VMEM limit.
        # NOTE: do not use tb > 2048 on v7x (64 MiB physical VMEM per TC).
        cp_kwargs["vmem_limit_bytes"] = 64 * 1024 * 1024

    flops = 2 * B * (in_size * w1.shape[1]
                     + w1.shape[1] * w2.shape[1]
                     + w2.shape[1] * w3t.shape[0])
    bytes_accessed = (B * in_size * 4 + B * out_size * 4
                      + 2 * (w1.size + w2.size + w3t.size)
                      + 4 * (b1.size + b2.size + b3.size))
    cost = pl.CostEstimate(flops=flops, transcendentals=B * out_size,
                           bytes_accessed=bytes_accessed)

    resident = lambda a: pl.BlockSpec(a.shape, lambda i: (0, 0))  # stays in VMEM

    out = pl.pallas_call(
        dense_net_kernel,
        out_shape=jax.ShapeDtypeStruct((out_size, B), jnp.float32),
        grid_spec=pl.GridSpec(
            grid=grid,
            in_specs=[
                pl.BlockSpec((tb, in_size), lambda i: (i, 0)),   # x: streamed, f32
                resident(w1), resident(b1),
                resident(w2), resident(b2),
                resident(w3t), resident(b3),
            ],
            out_specs=pl.BlockSpec((out_size, tb), lambda i: (0, i)),  # lane-dense
        ),
        compiler_params=pltpu.CompilerParams(**cp_kwargs),
        cost_estimate=cost,
    )(x, w1, b1, w2, b2, w3t, b3)

    return out.T                                             # (B, out_size)


def init_params(key, input_size=208, hidden_sizes=(512, 256), output_size=1):
    """Deterministic init mirroring nn.Linear default (uniform +/- 1/sqrt(fan_in))."""
    sizes = [input_size] + list(hidden_sizes) + [output_size]
    params = {}
    keys = jax.random.split(key, 2 * (len(sizes) - 1))
    for li in range(len(sizes) - 1):
        fan_in, fan_out = sizes[li], sizes[li + 1]
        bound = 1.0 / jnp.sqrt(fan_in)
        params[f"w{li + 1}"] = jax.random.uniform(
            keys[2 * li], (fan_in, fan_out), minval=-bound, maxval=bound, dtype=jnp.float32)
        params[f"b{li + 1}"] = jax.random.uniform(
            keys[2 * li + 1], (1, fan_out), minval=-bound, maxval=bound, dtype=jnp.float32)
    return params


def reference_forward(x, params):
    x = x.reshape(x.shape[0], -1)
    h = jnp.maximum(x @ params["w1"] + params["b1"], 0.0)
    h = jnp.maximum(h @ params["w2"] + params["b2"], 0.0)
    return jax.nn.sigmoid(h @ params["w3"] + params["b3"])


if __name__ == "__main__":
    key = jax.random.PRNGKey(0)
    k_x, k_p = jax.random.split(key)

    INPUT_SIZE = 208
    HIDDEN_SIZES = (512, 256)
    OUTPUT_SIZE = 1

    params = init_params(k_p, INPUT_SIZE, HIDDEN_SIZES, OUTPUT_SIZE)
    prepared = prepare_params(params)   # one-time cast/transpose, hoisted out of forward

    # Case 1: small batch -> single grid step (all blocks equal full array dims).
    x1 = jax.random.normal(k_x, (20, INPUT_SIZE), dtype=jnp.float32)
    out1 = jax.block_until_ready(dense_net_forward(x1, prepared))
    ref1 = reference_forward(x1, params)
    assert out1.shape == (20, OUTPUT_SIZE), out1.shape
    assert jnp.allclose(out1, ref1, atol=2e-2, rtol=2e-2), (
        "small-batch mismatch", float(jnp.max(jnp.abs(out1 - ref1))))

    # Case 2: multi-step grid with a ragged tail (exercises the lane-dense (1, tb)
    # transposed output blocks, the parallel batch axis, and the in-kernel bf16 cast).
    x2 = jax.random.normal(k_x, (300, INPUT_SIZE), dtype=jnp.float32)
    out2 = jax.block_until_ready(dense_net_forward(x2, prepared, batch_tile=128))
    ref2 = reference_forward(x2, params)
    assert out2.shape == (300, OUTPUT_SIZE), out2.shape
    assert jnp.allclose(out2, ref2, atol=2e-2, rtol=2e-2), (
        "multi-step mismatch", float(jnp.max(jnp.abs(out2 - ref2))))

    print("KERNEL_OK")
</pallas_src>

<mosaic_0001>
module attributes {stable_mosaic.version = 11 : i64} {
  func.func @dense_net_kernel(%arg0: i32, %arg1: memref<20x208xf32, #tpu.memory_space<vmem>>, %arg2: memref<208x512xbf16, #tpu.memory_space<vmem>>, %arg3: memref<1x512xf32, #tpu.memory_space<vmem>>, %arg4: memref<512x256xbf16, #tpu.memory_space<vmem>>, %arg5: memref<1x256xf32, #tpu.memory_space<vmem>>, %arg6: memref<8x256xbf16, #tpu.memory_space<vmem>>, %arg7: memref<1x1xf32, #tpu.memory_space<vmem>>, %arg8: memref<1x20xf32, #tpu.memory_space<vmem>>) attributes {dimension_semantics = [#tpu.dimension_semantics<parallel>], iteration_bounds = array<i64: 1>, scalar_prefetch = 0 : i64, scratch_operands = 0 : i64, tpu.core_type = #tpu.core_type<tc>, window_params = [{transform_indices = @transform_0, window_bounds = array<i64: 20, 208>}, {pipeline_mode = #tpu.pipeline_mode<synchronous>, transform_indices = @transform_1, window_bounds = array<i64: 208, 512>}, {pipeline_mode = #tpu.pipeline_mode<synchronous>, transform_indices = @transform_2, window_bounds = array<i64: 1, 512>}, {pipeline_mode = #tpu.pipeline_mode<synchronous>, transform_indices = @transform_3, window_bounds = array<i64: 512, 256>}, {pipeline_mode = #tpu.pipeline_mode<synchronous>, transform_indices = @transform_4, window_bounds = array<i64: 1, 256>}, {pipeline_mode = #tpu.pipeline_mode<synchronous>, transform_indices = @transform_5, window_bounds = array<i64: 8, 256>}, {pipeline_mode = #tpu.pipeline_mode<synchronous>, transform_indices = @transform_6, window_bounds = array<i64: 1, 1>}, {transform_indices = @transform_7, window_bounds = array<i64: 1, 20>}]} {
    %c0 = arith.constant 0 : index
    %c0_0 = arith.constant 0 : index
    %0 = vector.load %arg1[%c0, %c0_0] : memref<20x208xf32, #tpu.memory_space<vmem>>, vector<20x208xf32>
    %1 = arith.truncf %0 : vector<20x208xf32> to vector<20x208xbf16>
    %c0_1 = arith.constant 0 : index
    %c0_2 = arith.constant 0 : index
    %2 = vector.load %arg2[%c0_1, %c0_2] : memref<208x512xbf16, #tpu.memory_space<vmem>>, vector<208x512xbf16>
    %cst = arith.constant dense<0.000000e+00> : vector<20x512xf32>
    %3 = tpu.matmul %1, %2, %cst {dimension_numbers = #tpu.dot_dimension_numbers<[1], [0], [0], [1], [0, 0, 1, 1], [], []>} : vector<20x208xbf16>, vector<208x512xbf16>, vector<20x512xf32> -> vector<20x512xf32>
    %c0_3 = arith.constant 0 : index
    %c0_4 = arith.constant 0 : index
    %4 = vector.load %arg3[%c0_3, %c0_4] : memref<1x512xf32, #tpu.memory_space<vmem>>, vector<1x512xf32>
    %5 = vector.broadcast %4 : vector<1x512xf32> to vector<20x512xf32>
    %6 = arith.addf %3, %5 : vector<20x512xf32>
    %cst_5 = arith.constant 0.000000e+00 : f32
    %7 = vector.broadcast %cst_5 : f32 to vector<20x512xf32>
    %8 = arith.maximumf %6, %7 : vector<20x512xf32>
    %9 = arith.truncf %8 : vector<20x512xf32> to vector<20x512xbf16>
    %c0_6 = arith.constant 0 : index
    %c0_7 = arith.constant 0 : index
    %10 = vector.load %arg4[%c0_6, %c0_7] : memref<512x256xbf16, #tpu.memory_space<vmem>>, vector<512x256xbf16>
    %cst_8 = arith.constant dense<0.000000e+00> : vector<20x256xf32>
    %11 = tpu.matmul %9, %10, %cst_8 {dimension_numbers = #tpu.dot_dimension_numbers<[1], [0], [0], [1], [0, 0, 1, 1], [], []>} : vector<20x512xbf16>, vector<512x256xbf16>, vector<20x256xf32> -> vector<20x256xf32>
    %c0_9 = arith.constant 0 : index
    %c0_10 = arith.constant 0 : index
    %12 = vector.load %arg5[%c0_9, %c0_10] : memref<1x256xf32, #tpu.memory_space<vmem>>, vector<1x256xf32>
    %13 = vector.broadcast %12 : vector<1x256xf32> to vector<20x256xf32>
    %14 = arith.addf %11, %13 : vector<20x256xf32>
    %cst_11 = arith.constant 0.000000e+00 : f32
    %15 = vector.broadcast %cst_11 : f32 to vector<20x256xf32>
    %16 = arith.maximumf %14, %15 : vector<20x256xf32>
    %c0_12 = arith.constant 0 : index
    %c0_13 = arith.constant 0 : index
    %17 = vector.load %arg6[%c0_12, %c0_13] : memref<8x256xbf16, #tpu.memory_space<vmem>>, vector<8x256xbf16>
    %18 = arith.truncf %16 : vector<20x256xf32> to vector<20x256xbf16>
    %cst_14 = arith.constant dense<0.000000e+00> : vector<8x20xf32>
    %19 = tpu.matmul %17, %18, %cst_14 {dimension_numbers = #tpu.dot_dimension_numbers<[1], [1], [0], [0], [0, 0, 1, 0], [], []>} : vector<8x256xbf16>, vector<20x256xbf16>, vector<8x20xf32> -> vector<8x20xf32>
    %20 = vector.extract_strided_slice %19 {offsets = [0, 0], sizes = [1, 20], strides = [1, 1]} : vector<8x20xf32> to vector<1x20xf32>
    %c0_15 = arith.constant 0 : index
    %c0_16 = arith.constant 0 : index
    %21 = vector.load %arg7[%c0_15, %c0_16] : memref<1x1xf32, #tpu.memory_space<vmem>>, vector<1x1xf32>
    %22 = vector.broadcast %21 : vector<1x1xf32> to vector<1x20xf32>
    %23 = arith.addf %20, %22 : vector<1x20xf32>
    %24 = arith.negf %23 : vector<1x20xf32>
    %25 = math.exp %24 : vector<1x20xf32>
    %cst_17 = arith.constant 1.000000e+00 : f32
    %26 = vector.broadcast %cst_17 : f32 to vector<1x20xf32>
    %27 = arith.addf %26, %25 : vector<1x20xf32>
    %28 = arith.divf %26, %27 : vector<1x20xf32>
    %c0_18 = arith.constant 0 : index
    %c0_19 = arith.constant 0 : index
    %29 = vector.load %arg8[%c0_18, %c0_19] : memref<1x20xf32, #tpu.memory_space<vmem>>, vector<1x20xf32>
    tpu.vector_store %arg8[%c0_18, %c0_19], %28 {strides = array<i32>} : memref<1x20xf32, #tpu.memory_space<vmem>>, vector<1x20xf32>,
    return
  }
  func.func @transform_0(%arg0: i32) -> (i32, i32) {
    %c0_i32 = arith.constant 0 : i32
    %c0_i32_0 = arith.constant 0 : i32
    return %arg0, %c0_i32 : i32, i32
  }
  func.func @transform_1(%arg0: i32) -> (i32, i32) {
    %c0_i32 = arith.constant 0 : i32
    %c0_i32_0 = arith.constant 0 : i32
    %c0_i32_1 = arith.constant 0 : i32
    return %c0_i32, %c0_i32_0 : i32, i32
  }
  func.func @transform_2(%arg0: i32) -> (i32, i32) {
    %c0_i32 = arith.constant 0 : i32
    %c0_i32_0 = arith.constant 0 : i32
    %c0_i32_1 = arith.constant 0 : i32
    return %c0_i32, %c0_i32_0 : i32, i32
  }
  func.func @transform_3(%arg0: i32) -> (i32, i32) {
    %c0_i32 = arith.constant 0 : i32
    %c0_i32_0 = arith.constant 0 : i32
    %c0_i32_1 = arith.constant 0 : i32
    return %c0_i32, %c0_i32_0 : i32, i32
  }
  func.func @transform_4(%arg0: i32) -> (i32, i32) {
    %c0_i32 = arith.constant 0 : i32
    %c0_i32_0 = arith.constant 0 : i32
    %c0_i32_1 = arith.constant 0 : i32
    return %c0_i32, %c0_i32_0 : i32, i32
  }
  func.func @transform_5(%arg0: i32) -> (i32, i32) {
    %c0_i32 = arith.constant 0 : i32
    %c0_i32_0 = arith.constant 0 : i32
    %c0_i32_1 = arith.constant 0 : i32
    return %c0_i32, %c0_i32_0 : i32, i32
  }
  func.func @transform_6(%arg0: i32) -> (i32, i32) {
    %c0_i32 = arith.constant 0 : i32
    %c0_i32_0 = arith.constant 0 : i32
    %c0_i32_1 = arith.constant 0 : i32
    return %c0_i32, %c0_i32_0 : i32, i32
  }
  func.func @transform_7(%arg0: i32) -> (i32, i32) {
    %c0_i32 = arith.constant 0 : i32
    %c0_i32_0 = arith.constant 0 : i32
    return %c0_i32, %arg0 : i32, i32
  }
}

</mosaic_0001>

<bundles_post_ra>
// kernel: tpu_custom_call.1
= control target key start
LH: loop header
LB: loop body
LE: loop exit
PB: predicated region body
PF: predicated region fallthrough
CT: control target
= control target key end

     0   :  { %s2139_s0 = inlined_call_operand.hbm [shape: f32[20,208], index: 0, kind: input, shape index: {}]   ;;  %s2140_s1 = inlined_call_operand.hbm [shape: bf16[208,512], index: 1, kind: input, shape index: {}]   ;;  %s2141_s2 = inlined_call_operand.hbm [shape: f32[1,512], index: 2, kind: input, shape index: {}]   ;;  %s2142_s3 = inlined_call_operand.hbm [shape: bf16[512,256], index: 3, kind: input, shape index: {}]   ;;  %s2143_s4 = inlined_call_operand.vmem [shape: f32[1,256], index: 4, kind: input, shape index: {}]   ;;  %s2144_s5 = inlined_call_operand.hbm [shape: bf16[8,256], index: 5, kind: input, shape index: {}]   ;;  %s2145_s6 = inlined_call_operand.<no memory space> [shape: f32[1,1], index: 6, kind: input, shape index: {}]   ;;  %s2146_s7 = inlined_call_operand.hbm [shape: f32[1,20], index: 7, kind: output, shape index: {}]  }
   0x1   :  { %v12_v0 = vstv %s2145_s6 }
   0x2   :  { %13 = vst [vmem:[#allocation2] sm:$0x1] %v12_v0 }
   0x3   :  { %14 = vsyncpa [#allocation4], 0 }
   0x4   :  { %15 = vsyncpa [#allocation7], 0 }
   0x5   :  { %16 = vsyncpa [#allocation10], 0 }
   0x6   :  { %17 = vsyncpa [#allocation5], 0  ;;  %s35_s28 = sshll.u32 %s2140_s1, 4  ;;  %s1990_s29 = smov [#allocation6]   ;;  %s36_s28 = int_to_ptr.hbm [resolvable:$true] %s35_s28 }
   0x7   :  { %s37_s30 = sshll.u32 %s1990_s29, 4  ;;  %s59_s10 = sshll.u32 %s2142_s3, 4  ;;  %s38_s30 = int_to_ptr.vmem [resolvable:$true] %s37_s30  ;;  %s60_s10 = int_to_ptr.hbm [resolvable:$true] %s59_s10 }
   0x8   :  { %s1991_s11 = smov 256   ;;  %s1992_s12 = smov 16  }
   0x9   :  { %43 = dma.hbm_to_vmem [thread:$0]  %s36_s28, 6656, %s38_s30, [#allocation7], %s1991_s11, %s1991_s11, %s1992_s12  }
   0xa   :  { %s1993_s6 = smov [#allocation9]   ;;  %s1994_s14 = smov 128  }
   0xb   :  { %s61_s13 = sshll.u32 %s1993_s6, 4  ;;  %s1995_s15 = smov 8   ;;  %s62_s13 = int_to_ptr.vmem [resolvable:$true] %s61_s13 }
   0xc   :  { %67 = dma.hbm_to_vmem [thread:$0]  %s60_s10, 8192, %s62_s13, [#allocation10], %s1994_s14, %s1994_s14, %s1995_s15  }
   0xd   :  { %s22_s17 = sshll.u32 %s2139_s0, 4  ;;  %s1996_s18 = smov [#allocation3]   ;;  %s23_s17 = int_to_ptr.hbm [resolvable:$true] %s22_s17 }
   0xe   :  { %s24_s19 = sshll.u32 %s1996_s18, 4  ;;  %s49_s21 = sshll.u32 %s2141_s2, 4  ;;  %s25_s19 = int_to_ptr.vmem [resolvable:$true] %s24_s19  ;;  %s50_s21 = int_to_ptr.hbm [resolvable:$true] %s49_s21 }
   0xf   :  { %30 = dma.hbm_to_vmem [thread:$0]  %s23_s17, 768, %s25_s19, [#allocation4], %s1991_s11, %s1991_s11, %s1992_s12  }
  0x10   :  { %s1997_s22 = smov [#allocation8]   ;;  %s75_s26 = sshll.u32 %s2144_s5, 4  ;;  %s76_s26 = int_to_ptr.hbm [resolvable:$true] %s75_s26 }
  0x11   :  { %s51_s23 = sshll.u32 %s1997_s22, 4  ;;  %s1998_s0 = smov [#allocation11]   ;;  %s52_s23 = int_to_ptr.vmem [resolvable:$true] %s51_s23 }
  0x12   :  { %54 = dma.hbm_to_vmem [thread:$0]  %s50_s21, 64, %s52_s23, [#allocation7]  }
  0x13   :  { %s77_s27 = sshll.u32 %s1998_s0, 4  ;;  %s78_s27 = int_to_ptr.vmem [resolvable:$true] %s77_s27 }
  0x14   :  { %80 = dma.hbm_to_vmem [thread:$0]  %s76_s26, 128, %s78_s27, [#allocation10]  }
  0x15   :  { %1982 = dma.done.wait [#allocation4], 768  }
  0x16   :  { %1983 = vsyncadd [#allocation4], 4294966528 }
  0x17   :  { %1984 = dma.done.wait [#allocation7], 6720  }
  0x18   :  { %1985 = vsyncadd [#allocation7], 4294960576 }
  0x19   :  { %1986 = dma.done.wait [#allocation10], 8320  }
  0x1a   :  { %1987 = vsyncadd [#allocation10], 4294958976  ;;  %v1347_v1 = vld [vmem:[#allocation6 + $0xe0] sm:$0xf]  ;;  %v1736_v2 = vld [vmem:[#allocation6 + $0xec] sm:$0xf0] }
  0x1b   :  { %v1734_v3 = vld [vmem:[#allocation6 + $0xe4] sm:$0xf]  ;;  %v1348_v4 = vor.u32 %v1736_v2, %v1347_v1  ;;  %v1349_v5 = vld [vmem:[#allocation6 + $0xf0] sm:$0xf0]  ;;  %v1331_v10 = vld [vmem:[#allocation6 + $0xc0] sm:$0xf] }
  0x1c   :  { %v1754_v6 = vld [vmem:[#allocation6 + $0x184] sm:$0xf]  ;;  %v1429_v7 = vld [vmem:[#allocation6 + $0x190] sm:$0xf0]  ;;  %v1352_v8 = vor.u32 %v1734_v3, %v1349_v5  ;;  %v1732_v11 = vld [vmem:[#allocation6 + $0xcc] sm:$0xf0] }
  0x1d   :  { %v1432_v9 = vor.u32 %v1754_v6, %v1429_v7  ;;  %v1427_v12 = vld [vmem:[#allocation6 + $0x180] sm:$0xf]  ;;  %443 = vmatpush.bf16.msra.mxu0 %v1348_v4  ;;  %v1332_v13 = vor.u32 %v1732_v11, %v1331_v10  ;;  %v1756_v14 = vld [vmem:[#allocation6 + $0x18c] sm:$0xf0]  ;;  %v1730_v15 = vld [vmem:[#allocation6 + $0xc4] sm:$0xf] }
  0x1e   :  { %v1333_v16 = vld [vmem:[#allocation6 + $0xd0] sm:$0xf0]  ;;  %479 = vmatpush.bf16.msra.mxu2 %v1352_v8  ;;  %v1428_v17 = vor.u32 %v1756_v14, %v1427_v12  ;;  %v1750_v19 = vld [vmem:[#allocation6 + $0x164] sm:$0xf]  ;;  %v1315_v21 = vld [vmem:[#allocation6 + $0xa0] sm:$0xf] }
  0x1f   :  { %500 = vmatpush.bf16.msra.mxu3 %v1432_v9  ;;  %v1336_v18 = vor.u32 %v1730_v15, %v1333_v16  ;;  %v1413_v20 = vld [vmem:[#allocation6 + $0x170] sm:$0xf0]  ;;  %v1728_v23 = vld [vmem:[#allocation6 + $0xac] sm:$0xf0]  ;;  %v1411_v24 = vld [vmem:[#allocation6 + $0x160] sm:$0xf] }
  0x20   :  { %v1416_v22 = vor.u32 %v1750_v19, %v1413_v20  ;;  %v1752_v25 = vld [vmem:[#allocation6 + $0x16c] sm:$0xf0]  ;;  %464 = vmatpush.bf16.msra.mxu1 %v1428_v17  ;;  %v1726_v27 = vld [vmem:[#allocation6 + $0xa4] sm:$0xf]  ;;  %v1317_v28 = vld [vmem:[#allocation6 + $0xb0] sm:$0xf0]  ;;  %v1316_v30 = vor.u32 %v1728_v23, %v1315_v21 }
  0x21   :  { %v1412_v26 = vor.u32 %v1752_v25, %v1411_v24  ;;  %v1746_v29 = vld [vmem:[#allocation6 + $0x144] sm:$0xf]  ;;  %444 = vmatpush.bf16.msra.mxu0 %v1332_v13  ;;  %v1397_v31 = vld [vmem:[#allocation6 + $0x150] sm:$0xf0]  ;;  %v1299_v32 = vld [vmem:[#allocation6 + $0x80] sm:$0xf]  ;;  %v1320_v34 = vor.u32 %v1726_v27, %v1317_v28 }
  0x22   :  { %v1724_v33 = vld [vmem:[#allocation6 + $0x8c] sm:$0xf0]  ;;  %480 = vmatpush.bf16.msra.mxu2 %v1336_v18  ;;  %v1400_v35 = vor.u32 %v1746_v29, %v1397_v31  ;;  %v1395_v36 = vld [vmem:[#allocation6 + $0x140] sm:$0xf]  ;;  %v1722_v38 = vld [vmem:[#allocation6 + $0x84] sm:$0xf] }
  0x23   :  { %501 = vmatpush.bf16.msra.mxu3 %v1416_v22  ;;  %v1748_v37 = vld [vmem:[#allocation6 + $0x14c] sm:$0xf0]  ;;  %v1301_v39 = vld [vmem:[#allocation6 + $0x90] sm:$0xf0]  ;;  %v1742_v40 = vld [vmem:[#allocation6 + $0x124] sm:$0xf]  ;;  %v1300_v43 = vor.u32 %v1724_v33, %v1299_v32 }
  0x24   :  { %v1381_v41 = vld [vmem:[#allocation6 + $0x130] sm:$0xf0]  ;;  %465 = vmatpush.bf16.msra.mxu1 %v1412_v26  ;;  %v1396_v42 = vor.u32 %v1748_v37, %v1395_v36  ;;  %v1379_v44 = vld [vmem:[#allocation6 + $0x120] sm:$0xf]  ;;  %v1744_v45 = vld [vmem:[#allocation6 + $0x12c] sm:$0xf0]  ;;  %v1304_v46 = vor.u32 %v1722_v38, %v1301_v39 }
  0x25   :  { %445 = vmatpush.bf16.msra.mxu0 %v1316_v30  ;;  %v1384_v47 = vor.u32 %v1742_v40, %v1381_v41  ;;  %v1283_v48 = vld [vmem:[#allocation6 + $0x60] sm:$0xf]  ;;  %v1720_v49 = vld [vmem:[#allocation6 + $0x6c] sm:$0xf0]  ;;  %v1718_v50 = vld [vmem:[#allocation6 + $0x64] sm:$0xf]  ;;  %v1380_v54 = vor.u32 %v1744_v45, %v1379_v44 }
  0x26   :  { %481 = vmatpush.bf16.msra.mxu2 %v1320_v34  ;;  %v1285_v51 = vld [vmem:[#allocation6 + $0x70] sm:$0xf0]  ;;  %v1738_v52 = vld [vmem:[#allocation6 + $0x104] sm:$0xf]  ;;  %v105_v55 = vld [vmem:[#allocation3 + $0x8] sm:$0xff]  ;;  %v1284_v56 = vor.u32 %v1720_v49, %v1283_v48  ;;  %vm436_vm0 = vcmask 654336  }
  0x27   :  { %502 = vmatpush.bf16.msra.mxu3 %v1400_v35  ;;  %v1365_v53 = vld [vmem:[#allocation6 + $0x110] sm:$0xf0]  ;;  %v107_v57 = vld [vmem:[#allocation3 + $0x18] sm:$0xff]  ;;  %v1363_v58 = vld [vmem:[#allocation6 + $0x100] sm:$0xf]  ;;  %v1288_v60 = vor.u32 %v1718_v50, %v1285_v51  ;;  %s1221_s8 = sshll.u32 %s2146_s7, 4  ;;  %s1222_s8 = int_to_ptr.hbm [resolvable:$true] %s1221_s8 }
  0x28   :  { %466 = vmatpush.bf16.msra.mxu1 %v1396_v42  ;;  %v1740_v59 = vld [vmem:[#allocation6 + $0x10c] sm:$0xf0]  ;;  %v1368_v61 = vor.u32 %v1738_v52, %v1365_v53  ;;  %v1267_v62 = vld [vmem:[#allocation6 + $0x40] sm:$0xf]  ;;  %v1714_v0 = vld [vmem:[#allocation6 + $0x44] sm:$0xf]  ;;  %v2059_v5 = vpack.c.bf16 %v107_v57, %v105_v55 }
  0x29   :  { %446 = vmatpush.bf16.msra.mxu0 %v1300_v43  ;;  %v1716_v63 = vld [vmem:[#allocation6 + $0x4c] sm:$0xf0]  ;;  %v1269_v1 = vld [vmem:[#allocation6 + $0x50] sm:$0xf0]  ;;  %v1355_v2 = vld [vmem:[#allocation6 + $0xe8] sm:$0xf]  ;;  %v1364_v4 = vor.u32 %v1740_v59, %v1363_v58 }
  0x2a   :  { %482 = vmatpush.bf16.msra.mxu2 %v1304_v46  ;;  %v1737_v3 = vld [vmem:[#allocation6 + $0xf4] sm:$0xf0]  ;;  %v1268_v6 = vor.u32 %v1716_v63, %v1267_v62  ;;  %v1251_v7 = vld [vmem:[#allocation6 + $0x20] sm:$0xf]  ;;  %v1712_v8 = vld [vmem:[#allocation6 + $0x2c] sm:$0xf0]  ;;  %v1272_v9 = vor.u32 %v1714_v0, %v1269_v1 }
  0x2b   :  { %503 = vmatpush.bf16.msra.mxu3 %v1384_v47  ;;  %v1710_v10 = vld [vmem:[#allocation6 + $0x24] sm:$0xf]  ;;  %v1253_v11 = vld [vmem:[#allocation6 + $0x30] sm:$0xf0]  ;;  %v1356_v12 = vor.u32 %v1737_v3, %v1355_v2  ;;  %v1435_v13 = vld [vmem:[#allocation6 + $0x188] sm:$0xf]  ;;  %v1252_v18 = vor.u32 %v1712_v8, %v1251_v7 }
  0x2c   :  { %467 = vmatpush.bf16.msra.mxu1 %v1380_v54  ;;  %v1339_v14 = vld [vmem:[#allocation6 + $0xc8] sm:$0xf]  ;;  %v1733_v15 = vld [vmem:[#allocation6 + $0xd4] sm:$0xf0]  ;;  %v1235_v19 = vld [vmem:[#allocation6] sm:$0xf]  ;;  %v1256_v22 = vor.u32 %v1710_v10, %v1253_v11 }
  0x2d   :  { %447 = vmatpush.bf16.msra.mxu0 %v1284_v56  ;;  %v1757_v16 = vld [vmem:[#allocation6 + $0x194] sm:$0xf0]  ;;  %v1419_v20 = vld [vmem:[#allocation6 + $0x168] sm:$0xf]  ;;  %v1708_v23 = vld [vmem:[#allocation6 + $0xc] sm:$0xf0]  ;;  %v1340_v26 = vor.u32 %v1733_v15, %v1339_v14 }
  0x2e   :  { %483 = vmatpush.bf16.msra.mxu2 %v1288_v60  ;;  %v1436_v17 = vor.u32 %v1757_v16, %v1435_v13  ;;  %v1753_v21 = vld [vmem:[#allocation6 + $0x174] sm:$0xf0]  ;;  %v1706_v24 = vld [vmem:[#allocation6 + $0x4] sm:$0xf]  ;;  %v1237_v25 = vld [vmem:[#allocation6 + $0x10] sm:$0xf0]  ;;  %v1236_v34 = vor.u32 %v1708_v23, %v1235_v19 }
  0x2f   :  { %504 = vmatpush.bf16.msra.mxu3 %v1368_v61  ;;  %v1323_v27 = vld [vmem:[#allocation6 + $0xa8] sm:$0xf]  ;;  %v1729_v28 = vld [vmem:[#allocation6 + $0xb4] sm:$0xf0]  ;;  %v1735_v29 = vld [vmem:[#allocation6 + $0xec] sm:$0xf]  ;;  %v1420_v30 = vor.u32 %v1753_v21, %v1419_v20  ;;  %v1240_v37 = vor.u32 %v1706_v24, %v1237_v25 }
  0x30   :  { %468 = vmatpush.bf16.msra.mxu1 %v1364_v4  ;;  %v1357_v31 = vld [vmem:[#allocation6 + $0xf8] sm:$0xf0]  ;;  %v1403_v32 = vld [vmem:[#allocation6 + $0x148] sm:$0xf]  ;;  %v1749_v33 = vld [vmem:[#allocation6 + $0x154] sm:$0xf0]  ;;  %v1324_v38 = vor.u32 %v1729_v28, %v1323_v27 }
  0x31   :  { %448 = vmatpush.bf16.msra.mxu0 %v1268_v6  ;;  %v104_v35 = vld [vmem:[#allocation3] sm:$0xff]  ;;  %v106_v36 = vld [vmem:[#allocation3 + $0x10] sm:$0xff]  ;;  %v1755_v39 = vld [vmem:[#allocation6 + $0x18c] sm:$0xf]  ;;  %v1360_v41 = vor.u32 %v1735_v29, %v1357_v31  ;;  %v1404_v45 = vor.u32 %v1749_v33, %v1403_v32  ;;  %vm1212_vm4 = vcmask 155648  }
  0x32   :  { %1443 = vmatmul.msk.bf16.vlgmr.msra.gmra.mxu3 %vm436_vm0, %v2059_v5  ;;  %484 = vmatpush.bf16.msra.mxu2 %v1272_v9  ;;  %v1437_v40 = vld [vmem:[#allocation6 + $0x198] sm:$0xf0]  ;;  %v1307_v42 = vld [vmem:[#allocation6 + $0x88] sm:$0xf]  ;;  %v1725_v43 = vld [vmem:[#allocation6 + $0x94] sm:$0xf0]  ;;  %v2065_v46 = vpack.c.bf16 %v106_v36, %v104_v35 }
  0x33   :  { %1441 = vmatmul.msk.bf16.vlgmr.msra.gmra.mxu1 %vm436_vm0, %v2059_v5  ;;  %536 = vmatpush.bf16.msrb.mxu3 %v1436_v17  ;;  %v1731_v44 = vld [vmem:[#allocation6 + $0xcc] sm:$0xf]  ;;  %v1341_v47 = vld [vmem:[#allocation6 + $0xd8] sm:$0xf0]  ;;  %v1387_v48 = vld [vmem:[#allocation6 + $0x128] sm:$0xf]  ;;  %v1440_v50 = vor.u32 %v1755_v39, %v1437_v40  ;;  %v1308_v54 = vor.u32 %v1725_v43, %v1307_v42 }
  0x34   :  { %515 = vmatpush.bf16.msrb.mxu1 %v1356_v12  ;;  %v1745_v49 = vld [vmem:[#allocation6 + $0x134] sm:$0xf0]  ;;  %v1751_v51 = vld [vmem:[#allocation6 + $0x16c] sm:$0xf]  ;;  %v1421_v52 = vld [vmem:[#allocation6 + $0x178] sm:$0xf0]  ;;  %v1344_v55 = vor.u32 %v1731_v44, %v1341_v47 }
  0x35   :  { %449 = vmatpush.bf16.msra.mxu0 %v1252_v18  ;;  %v109_v53 = vld [vmem:[#allocation3 + $0x28] sm:$0xf]  ;;  %v1291_v56 = vld [vmem:[#allocation6 + $0x68] sm:$0xf]  ;;  %v1388_v58 = vor.u32 %v1745_v49, %v1387_v48  ;;  %v1727_v59 = vld [vmem:[#allocation6 + $0xac] sm:$0xf]  ;;  %v1424_v62 = vor.u32 %v1751_v51, %v1421_v52 }
  0x36   :  { %485 = vmatpush.bf16.msra.mxu2 %v1256_v22  ;;  %v1721_v57 = vld [vmem:[#allocation6 + $0x74] sm:$0xf0]  ;;  %v1325_v60 = vld [vmem:[#allocation6 + $0xb8] sm:$0xf0]  ;;  %v1371_v61 = vld [vmem:[#allocation6 + $0x108] sm:$0xf]  ;;  %v2069_v63 = vpack.c.bf16 %v109_v53, %v109_v53 }
  0x37   :  { %537 = vmatpush.bf16.msrb.mxu3 %v1420_v30  ;;  %v1741_v0 = vld [vmem:[#allocation6 + $0x114] sm:$0xf0]  ;;  %v1747_v1 = vld [vmem:[#allocation6 + $0x14c] sm:$0xf]  ;;  %v1405_v2 = vld [vmem:[#allocation6 + $0x158] sm:$0xf0]  ;;  %v1292_v3 = vor.u32 %v1721_v57, %v1291_v56  ;;  %v1328_v4 = vor.u32 %v1727_v59, %v1325_v60 }
  0x38   :  { %516 = vmatpush.bf16.msrb.mxu1 %v1340_v26  ;;  %v1275_v6 = vld [vmem:[#allocation6 + $0x48] sm:$0xf]  ;;  %v1717_v7 = vld [vmem:[#allocation6 + $0x54] sm:$0xf0]  ;;  %v1723_v8 = vld [vmem:[#allocation6 + $0x8c] sm:$0xf]  ;;  %v1372_v10 = vor.u32 %v1741_v0, %v1371_v61  ;;  %v1408_v11 = vor.u32 %v1747_v1, %v1405_v2 }
  0x39   :  { %450 = vmatpush.bf16.msra.mxu0 %v1236_v34  ;;  %v1309_v9 = vld [vmem:[#allocation6 + $0x98] sm:$0xf0]  ;;  %v1743_v12 = vld [vmem:[#allocation6 + $0x12c] sm:$0xf]  ;;  %v1276_v14 = vor.u32 %v1717_v7, %v1275_v6  ;;  %v1259_v16 = vld [vmem:[#allocation6 + $0x28] sm:$0xf] }
  0x3a   :  { %486 = vmatpush.bf16.msra.mxu2 %v1240_v37  ;;  %v1389_v13 = vld [vmem:[#allocation6 + $0x138] sm:$0xf0]  ;;  %v1312_v15 = vor.u32 %v1723_v8, %v1309_v9  ;;  %v1713_v17 = vld [vmem:[#allocation6 + $0x34] sm:$0xf0]  ;;  %v1719_v18 = vld [vmem:[#allocation6 + $0x6c] sm:$0xf] }
  0x3b   :  { %538 = vmatpush.bf16.msrb.mxu3 %v1404_v45  ;;  %v1293_v19 = vld [vmem:[#allocation6 + $0x78] sm:$0xf0]  ;;  %v1392_v20 = vor.u32 %v1743_v12, %v1389_v13  ;;  %v108_v21 = vld [vmem:[#allocation3 + $0x20] sm:$0xf]  ;;  %v1739_v22 = vld [vmem:[#allocation6 + $0x10c] sm:$0xf]  ;;  %v1260_v24 = vor.u32 %v1713_v17, %v1259_v16 }
  0x3c   :  { %517 = vmatpush.bf16.msrb.mxu1 %v1324_v38  ;;  %451 = vmatmul.bf16.vlgmr.msra.gmra.mxu0 %v2065_v46  ;;  %v1373_v23 = vld [vmem:[#allocation6 + $0x118] sm:$0xf0]  ;;  %v1296_v25 = vor.u32 %v1719_v18, %v1293_v19  ;;  %v1243_v26 = vld [vmem:[#allocation6 + $0x8] sm:$0xf]  ;;  %v1709_v27 = vld [vmem:[#allocation6 + $0x14] sm:$0xf0]  ;;  %v112_v28 = vpack.c.bf16 %v108_v21, %v108_v21 }
  0x3d   :  { %551 = vmatpush.bf16.msrb.mxu0 %v1360_v41  ;;  %487 = vmatmul.bf16.vlgmr.msra.gmra.mxu2 %v2065_v46  ;;  %v1715_v29 = vld [vmem:[#allocation6 + $0x4c] sm:$0xf]  ;;  %v1277_v30 = vld [vmem:[#allocation6 + $0x58] sm:$0xf0]  ;;  %v1376_v31 = vor.u32 %v1739_v22, %v1373_v23  ;;  %v1244_v32 = vor.u32 %v1709_v27, %v1243_v26  ;;  %v1507_v36 = vld [vmem:[#allocation9 + $0x70] sm:$0xf] }
  0x3e   :  { %572 = vmatpush.bf16.msrb.mxu2 %v1440_v50  ;;  %v1280_v33 = vor.u32 %v1715_v29, %v1277_v30  ;;  %v1711_v34 = vld [vmem:[#allocation6 + $0x2c] sm:$0xf]  ;;  %v1261_v35 = vld [vmem:[#allocation6 + $0x38] sm:$0xf0]  ;;  %v1499_v38 = vld [vmem:[#allocation9 + $0x60] sm:$0xf] }
  0x3f   :  { %539 = vmatpush.bf16.msrb.mxu3 %v1388_v58  ;;  %v1773_v37 = vld [vmem:[#allocation9 + $0x74] sm:$0xf0]  ;;  %v1771_v40 = vld [vmem:[#allocation9 + $0x64] sm:$0xf0]  ;;  %v1264_v41 = vor.u32 %v1711_v34, %v1261_v35  ;;  %v1571_v47 = vld [vmem:[#allocation9 + $0xf0] sm:$0xf] }
  0x40   :  { %518 = vmatpush.bf16.msrb.mxu1 %v1308_v54  ;;  %v1508_v39 = vor.u32 %v1773_v37, %v1507_v36  ;;  %v1707_v42 = vld [vmem:[#allocation6 + $0xc] sm:$0xf]  ;;  %v1245_v43 = vld [vmem:[#allocation6 + $0x18] sm:$0xf0]  ;;  %v1500_v44 = vor.u32 %v1771_v40, %v1499_v38  ;;  %v1491_v50 = vld [vmem:[#allocation9 + $0x50] sm:$0xf] }
  0x41   :  { %552 = vmatpush.bf16.msrb.mxu0 %v1344_v55  ;;  %v1248_v45 = vor.u32 %v1707_v42, %v1245_v43  ;;  %v1789_v48 = vld [vmem:[#allocation9 + $0xf4] sm:$0xf0]  ;;  %v1563_v53 = vld [vmem:[#allocation9 + $0xe0] sm:$0xf]  ;;  %v1767_v55 = vld [vmem:[#allocation9 + $0x44] sm:$0xf0] }
  0x42   :  { %573 = vmatpush.bf16.msrb.mxu2 %v1424_v62  ;;  %1444 = vmatmul.msk.bf16.gmra.mxu3 %vm436_vm0, %v2069_v63  ;;  %v1572_v49 = vor.u32 %v1789_v48, %v1571_v47  ;;  %v1769_v51 = vld [vmem:[#allocation9 + $0x54] sm:$0xf0]  ;;  %v1555_v57 = vld [vmem:[#allocation9 + $0xd0] sm:$0xf]  ;;  %v1783_v0 = vld [vmem:[#allocation9 + $0xc4] sm:$0xf0] }
  0x43   :  { %1442 = vmatmul.msk.bf16.gmra.mxu1 %vm436_vm0, %v2069_v63  ;;  %540 = vmatpush.bf16.msrb.mxu3 %v1372_v10  ;;  %v1492_v52 = vor.u32 %v1769_v51, %v1491_v50  ;;  %v1785_v58 = vld [vmem:[#allocation9 + $0xd4] sm:$0xf0]  ;;  %v1475_v60 = vld [vmem:[#allocation9 + $0x30] sm:$0xf]  ;;  %v1467_v2 = vld [vmem:[#allocation9 + $0x20] sm:$0xf] }
  0x44   :  { %519 = vmatpush.bf16.msrb.mxu1 %v1292_v3  ;;  %v1556_v59 = vor.u32 %v1785_v58, %v1555_v57  ;;  %v1765_v61 = vld [vmem:[#allocation9 + $0x34] sm:$0xf0]  ;;  %v1763_v3 = vld [vmem:[#allocation9 + $0x24] sm:$0xf0]  ;;  %v1539_v6 = vld [vmem:[#allocation9 + $0xb0] sm:$0xf] }
  0x45   :  { %553 = vmatpush.bf16.msrb.mxu0 %v1328_v4  ;;  %v1476_v62 = vor.u32 %v1765_v61, %v1475_v60  ;;  %v1468_v4 = vor.u32 %v1763_v3, %v1467_v2  ;;  %v1781_v7 = vld [vmem:[#allocation9 + $0xb4] sm:$0xf0]  ;;  %v1459_v9 = vld [vmem:[#allocation9 + $0x10] sm:$0xf]  ;;  %v1779_v16 = vld [vmem:[#allocation9 + $0xa4] sm:$0xf0] }
  0x46   :  { %574 = vmatpush.bf16.msrb.mxu2 %v1408_v11  ;;  %v1540_v8 = vor.u32 %v1781_v7, %v1539_v6  ;;  %v1761_v10 = vld [vmem:[#allocation9 + $0x14] sm:$0xf0]  ;;  %v1635_v11 = vld [vmem:[#allocation9 + $0x170] sm:$0xf]  ;;  %v1451_v18 = vld [vmem:[#allocation9] sm:$0xf] }
  0x47   :  { %1015 = vmatpush.bf16.msra.mxu3 %v1572_v49  ;;  %v1460_v12 = vor.u32 %v1761_v10, %v1459_v9  ;;  %v1805_v13 = vld [vmem:[#allocation9 + $0x174] sm:$0xf0]  ;;  %v1759_v19 = vld [vmem:[#allocation9 + $0x4] sm:$0xf0]  ;;  %v1619_v27 = vld [vmem:[#allocation9 + $0x150] sm:$0xf] }
  0x48   :  { %520 = vmatpush.bf16.msrb.mxu1 %v1276_v14  ;;  %v1636_v14 = vor.u32 %v1805_v13, %v1635_v11  ;;  %v1452_v21 = vor.u32 %v1759_v19, %v1451_v18  ;;  %v1803_v22 = vld [vmem:[#allocation9 + $0x164] sm:$0xf0]  ;;  %v1772_v29 = vld [vmem:[#allocation9 + $0x74] sm:$0xf]  ;;  %v1611_v36 = vld [vmem:[#allocation9 + $0x140] sm:$0xf] }
  0x49   :  { %554 = vmatpush.bf16.msrb.mxu0 %v1312_v15  ;;  %v1531_v15 = vld [vmem:[#allocation9 + $0xa0] sm:$0xf]  ;;  %v1775_v34 = vld [vmem:[#allocation9 + $0x84] sm:$0xf0]  ;;  %v1699_v38 = vld [vmem:[#allocation9 + $0x1f0] sm:$0xf] }
  0x4a   :  { %575 = vmatpush.bf16.msrb.mxu2 %v1392_v20  ;;  %v1532_v17 = vor.u32 %v1779_v16, %v1531_v15  ;;  %v1627_v20 = vld [vmem:[#allocation9 + $0x160] sm:$0xf]  ;;  %v1799_v37 = vld [vmem:[#allocation9 + $0x144] sm:$0xf0]  ;;  %v1821_v40 = vld [vmem:[#allocation9 + $0x1f4] sm:$0xf0] }
  0x4b   :  { %v1628_v23 = vor.u32 %v1803_v22, %v1627_v20  ;;  %v1501_v42 = vld [vmem:[#allocation9 + $0x68] sm:$0xf0]  ;;  %v1700_v43 = vor.u32 %v1821_v40, %v1699_v38  ;;  %v1573_v47 = vld [vmem:[#allocation9 + $0xf8] sm:$0xf0]  ;;  %v1603_v50 = vld [vmem:[#allocation9 + $0x130] sm:$0xf] }
  0x4c   :  { %521 = vmatpush.bf16.msrb.mxu1 %v1260_v24  ;;  %456 = vmatmul.bf16.gmra.mxu0 %v112_v28  ;;  %v1523_v24 = vld [vmem:[#allocation9 + $0x90] sm:$0xf]  ;;  %v1797_v51 = vld [vmem:[#allocation9 + $0x134] sm:$0xf0]  ;;  %v1565_v57 = vld [vmem:[#allocation9 + $0xe8] sm:$0xf0] }
  0x4d   :  { %555 = vmatpush.bf16.msrb.mxu0 %v1296_v25  ;;  %492 = vmatmul.bf16.gmra.mxu2 %v112_v28  ;;  %v1777_v25 = vld [vmem:[#allocation9 + $0x94] sm:$0xf0]  ;;  %v1766_v3 = vld [vmem:[#allocation9 + $0x44] sm:$0xf]  ;;  %v1557_v9 = vld [vmem:[#allocation9 + $0xd8] sm:$0xf0] }
  0x4e   :  { %576 = vmatpush.bf16.msrb.mxu2 %v1376_v31  ;;  %v1524_v26 = vor.u32 %v1777_v25, %v1523_v24  ;;  %v1509_v31 = vld [vmem:[#allocation9 + $0x78] sm:$0xf0]  ;;  %v1817_v2 = vld [vmem:[#allocation9 + $0x1d4] sm:$0xf0]  ;;  %v1815_v18 = vld [vmem:[#allocation9 + $0x1c4] sm:$0xf0] }
  0x4f   :  { %v1793_v15 = vld [vmem:[#allocation9 + $0x114] sm:$0xf0]  ;;  %v1764_v19 = vld [vmem:[#allocation9 + $0x34] sm:$0xf]  ;;  %v1782_v22 = vld [vmem:[#allocation9 + $0xc4] sm:$0xf] }
  0x50   :  { %522 = vmatpush.bf16.msrb.mxu1 %v1244_v32  ;;  %v1512_v32 = vor.u32 %v1772_v29, %v1509_v31  ;;  %v1667_v29 = vld [vmem:[#allocation9 + $0x1b0] sm:$0xf] }
  0x51   :  { %556 = vmatpush.bf16.msrb.mxu0 %v1280_v33  ;;  %v1515_v33 = vld [vmem:[#allocation9 + $0x80] sm:$0xf] }
  0x52   :  { %1445 = vmatmul.msk.bf16.vlgmr.msrb.gmra.mxu3 %vm436_vm0, %v2059_v5  ;;  %v1516_v35 = vor.u32 %v1775_v34, %v1515_v33  ;;  %1051 = vmatpush.bf16.msra.mxu2 %v1700_v43  ;;  %v1762_v33 = vld [vmem:[#allocation9 + $0x24] sm:$0xf] }
  0x53   :  { %523 = vmatmul.bf16.vlgmr.msrb.gmra.mxu1 %v2065_v46 }
  0x54   :  { %997 = vmatpush.bf16.msra.mxu1 %v1508_v39  ;;  %v1612_v39 = vor.u32 %v1799_v37, %v1611_v36  ;;  %v1780_v36 = vld [vmem:[#allocation9 + $0xb4] sm:$0xf]  ;;  %v1541_v37 = vld [vmem:[#allocation9 + $0xb8] sm:$0xf0] }
  0x55   :  { %557 = vmatpush.bf16.msrb.mxu0 %v1264_v41  ;;  %v1770_v41 = vld [vmem:[#allocation9 + $0x64] sm:$0xf] }
  0x58   :  { %998 = vmatpush.bf16.msra.mxu1 %v1500_v44  ;;  %v1504_v44 = vor.u32 %v1770_v41, %v1501_v42  ;;  %v1544_v42 = vor.u32 %v1780_v36, %v1541_v37  ;;  %v1820_v37 = vld [vmem:[#allocation9 + $0x1f4] sm:$0xf] }
  0x59   :  { %558 = vmatpush.bf16.msrb.mxu0 %v1248_v45  ;;  %v1788_v45 = vld [vmem:[#allocation9 + $0xf4] sm:$0xf] }
  0x5a   :  { %v1576_v49 = vor.u32 %v1788_v45, %v1573_v47  ;;  %v1811_v45 = vld [vmem:[#allocation9 + $0x1a4] sm:$0xf0]  ;;  %v1760_v47 = vld [vmem:[#allocation9 + $0x14] sm:$0xf] }
  0x5c   :  { %559 = vmatmul.bf16.vlgmr.msrb.gmra.mxu0 %v2065_v46  ;;  %v1787_v46 = vld [vmem:[#allocation9 + $0xe4] sm:$0xf0]  ;;  %999 = vmatpush.bf16.msra.mxu1 %v1492_v52  ;;  %v1604_v52 = vor.u32 %v1797_v51, %v1603_v50 }
  0x5d   :  { %1447 = vmatmul.msk.bf16.vlgmr.msrb.gmra.mxu2 %vm436_vm0, %v2059_v5  ;;  %v1564_v54 = vor.u32 %v1787_v46, %v1563_v53  ;;  %v1483_v5 = vld [vmem:[#allocation9 + $0x40] sm:$0xf]  ;;  %1033 = vmatpush.bf16.msra.mxu0 %v1636_v14  ;;  %v1819_v46 = vld [vmem:[#allocation9 + $0x1e4] sm:$0xf0]  ;;  %v1587_v14 = vld [vmem:[#allocation9 + $0x110] sm:$0xf] }
  0x5e   :  { %v1484_v56 = vor.u32 %v1767_v55, %v1483_v5  ;;  %v1691_v53 = vld [vmem:[#allocation9 + $0x1e0] sm:$0xf]  ;;  %v1493_v55 = vld [vmem:[#allocation9 + $0x58] sm:$0xf0]  ;;  %v1588_v16 = vor.u32 %v1793_v15, %v1587_v14 }
  0x5f   :  { %1016 = vmatpush.bf16.msra.mxu3 %v1564_v54  ;;  %v1768_v54 = vld [vmem:[#allocation9 + $0x54] sm:$0xf]  ;;  %v1692_v5 = vor.u32 %v1819_v46, %v1691_v53  ;;  %v1637_v46 = vld [vmem:[#allocation9 + $0x178] sm:$0xf0] }
  0x60   :  { %1000 = vmatpush.bf16.msra.mxu1 %v1484_v56  ;;  %v1786_v56 = vld [vmem:[#allocation9 + $0xe4] sm:$0xf]  ;;  %v1496_v60 = vor.u32 %v1768_v54, %v1493_v55  ;;  %v1804_v53 = vld [vmem:[#allocation9 + $0x174] sm:$0xf]  ;;  %v1525_v15 = vld [vmem:[#allocation9 + $0x98] sm:$0xf0] }
  0x61   :  { %1034 = vmatpush.bf16.msra.mxu0 %v1628_v23  ;;  %v1568_v61 = vor.u32 %v1786_v56, %v1565_v57  ;;  %1052 = vmatpush.bf16.msra.mxu2 %v1692_v5  ;;  %v1549_v23 = vld [vmem:[#allocation9 + $0xc8] sm:$0xf0]  ;;  %v1640_v5 = vor.u32 %v1804_v53, %v1637_v46  ;;  %v1778_v55 = vld [vmem:[#allocation9 + $0xa4] sm:$0xf] }
  0x62   :  { %1446 = vmatmul.msk.bf16.gmra.mxu3 %vm436_vm0, %v2069_v63  ;;  %v1533_v56 = vld [vmem:[#allocation9 + $0xa8] sm:$0xf0] }
  0x63   :  { %528 = vmatmul.bf16.gmra.mxu1 %v112_v28  ;;  %1017 = vmatpush.bf16.msra.mxu3 %v1556_v59  ;;  %v2089_v59 = vld [vmem:[#allocation8] sm:$0xf] }
  0x64   :  { %1001 = vmatpush.bf16.msra.mxu1 %v1476_v62  ;;  %v1595_v62 = vld [vmem:[#allocation9 + $0x120] sm:$0xf]  ;;  %v2098_v38 = vperm.slane %v2089_v59, 1 }
  0x68   :  { %1002 = vmatpush.bf16.msra.mxu1 %v1468_v4  ;;  %v1485_v4 = vld [vmem:[#allocation9 + $0x48] sm:$0xf0] }
  0x69   :  { %v1488_v7 = vor.u32 %v1766_v3, %v1485_v4  ;;  %v1758_v3 = vld [vmem:[#allocation9 + $0x4] sm:$0xf]  ;;  %v1453_v4 = vld [vmem:[#allocation9 + $0x8] sm:$0xf0] }
  0x6c   :  { %564 = vmatmul.bf16.gmra.mxu0 %v112_v28  ;;  %1003 = vmatpush.bf16.msra.mxu1 %v1460_v12  ;;  %v1801_v28 = vld [vmem:[#allocation9 + $0x154] sm:$0xf0]  ;;  %v2092_v12 = vperm.slane %v2089_v59, 0 }
  0x6d   :  { %1448 = vmatmul.msk.bf16.gmra.mxu2 %vm436_vm0, %v2069_v63  ;;  %v1547_v63 = vld [vmem:[#allocation9 + $0xc0] sm:$0xf]  ;;  %v1620_v30 = vor.u32 %v1801_v28, %v1619_v27  ;;  %v1791_v28 = vld [vmem:[#allocation9 + $0x104] sm:$0xf0] }
  0x6e   :  { %v1548_v1 = vor.u32 %v1783_v0, %v1547_v63  ;;  %v1795_v63 = vld [vmem:[#allocation9 + $0x124] sm:$0xf0]  ;;  %v1683_v0 = vld [vmem:[#allocation9 + $0x1d0] sm:$0xf]  ;;  %v1579_v27 = vld [vmem:[#allocation9 + $0x100] sm:$0xf] }
  0x6f   :  { %1035 = vmatpush.bf16.msra.mxu0 %v1620_v30  ;;  %v1684_v6 = vor.u32 %v1817_v2, %v1683_v0  ;;  %v1580_v31 = vor.u32 %v1791_v28, %v1579_v27  ;;  %v1774_v28 = vld [vmem:[#allocation9 + $0x84] sm:$0xf] }
  0x70   :  { %1018 = vmatpush.bf16.msra.mxu3 %v1548_v1  ;;  %1004 = vmatpush.bf16.msra.mxu1 %v1452_v21  ;;  %v1596_v1 = vor.u32 %v1795_v63, %v1595_v62  ;;  %v1477_v21 = vld [vmem:[#allocation9 + $0x38] sm:$0xf0]  ;;  %v1809_v63 = vld [vmem:[#allocation9 + $0x194] sm:$0xf0] }
  0x71   :  { %1053 = vmatpush.bf16.msra.mxu2 %v1684_v6  ;;  %v1480_v25 = vor.u32 %v1764_v19, %v1477_v21  ;;  %v1456_v6 = vor.u32 %v1758_v3, %v1453_v4  ;;  %v1807_v21 = vld [vmem:[#allocation9 + $0x184] sm:$0xf0] }
  0x73   :  { %1036 = vmatpush.bf16.msra.mxu0 %v1612_v39 }
  0x74   :  { %1019 = vmatpush.bf16.msra.mxu3 %v1540_v8  ;;  %1069 = vmatpush.bf16.msrb.mxu1 %v1512_v32  ;;  %v1784_v8 = vld [vmem:[#allocation9 + $0xd4] sm:$0xf]  ;;  %v1813_v32 = vld [vmem:[#allocation9 + $0x1b4] sm:$0xf0] }
  0x75   :  { %v1560_v11 = vor.u32 %v1784_v8, %v1557_v9  ;;  %v1668_v34 = vor.u32 %v1813_v32, %v1667_v29  ;;  %v1629_v8 = vld [vmem:[#allocation9 + $0x168] sm:$0xf0]  ;;  %v1776_v9 = vld [vmem:[#allocation9 + $0x94] sm:$0xf] }
  0x76   :  { %v1528_v19 = vor.u32 %v1776_v9, %v1525_v15 }
  0x77   :  { %1037 = vmatpush.bf16.msra.mxu0 %v1604_v52  ;;  %v1461_v52 = vld [vmem:[#allocation9 + $0x18] sm:$0xf0] }
  0x78   :  { %1020 = vmatpush.bf16.msra.mxu3 %v1532_v17  ;;  %1070 = vmatpush.bf16.msrb.mxu1 %v1504_v44  ;;  %v1675_v17 = vld [vmem:[#allocation9 + $0x1c0] sm:$0xf]  ;;  %v1464_v54 = vor.u32 %v1760_v47, %v1461_v52  ;;  %v1796_v47 = vld [vmem:[#allocation9 + $0x134] sm:$0xf]  ;;  %v1693_v52 = vld [vmem:[#allocation9 + $0x1e8] sm:$0xf0] }
  0x79   :  { %v1676_v20 = vor.u32 %v1815_v18, %v1675_v17  ;;  %v1659_v44 = vld [vmem:[#allocation9 + $0x1a0] sm:$0xf] }
  0x7a   :  { %v1660_v51 = vor.u32 %v1811_v45, %v1659_v44 }
  0x7b   :  { %1038 = vmatpush.bf16.msra.mxu0 %v1596_v1  ;;  %1054 = vmatpush.bf16.msra.mxu2 %v1676_v20  ;;  %v1643_v20 = vld [vmem:[#allocation9 + $0x180] sm:$0xf] }
  0x7c   :  { %1021 = vmatpush.bf16.msra.mxu3 %v1524_v26  ;;  %1071 = vmatpush.bf16.msrb.mxu1 %v1496_v60  ;;  %v1552_v26 = vor.u32 %v1782_v22, %v1549_v23  ;;  %v1800_v22 = vld [vmem:[#allocation9 + $0x154] sm:$0xf]  ;;  %v1644_v23 = vor.u32 %v1807_v21, %v1643_v20  ;;  %v1669_v21 = vld [vmem:[#allocation9 + $0x1b8] sm:$0xf0] }
  0x7f   :  { %1039 = vmatpush.bf16.msra.mxu0 %v1588_v16  ;;  %1055 = vmatpush.bf16.msra.mxu2 %v1668_v34  ;;  %v1798_v34 = vld [vmem:[#allocation9 + $0x144] sm:$0xf] }
  0x80   :  { %1022 = vmatpush.bf16.msra.mxu3 %v1516_v35  ;;  %1072 = vmatpush.bf16.msrb.mxu1 %v1488_v7  ;;  %v1469_v35 = vld [vmem:[#allocation9 + $0x28] sm:$0xf0]  ;;  %v1802_v7 = vld [vmem:[#allocation9 + $0x164] sm:$0xf] }
  0x81   :  { %v1472_v41 = vor.u32 %v1762_v33, %v1469_v35  ;;  %v1632_v14 = vor.u32 %v1802_v7, %v1629_v8  ;;  %v1613_v35 = vld [vmem:[#allocation9 + $0x148] sm:$0xf0]  ;;  %v1589_v7 = vld [vmem:[#allocation9 + $0x118] sm:$0xf0]  ;;  %v1814_v8 = vld [vmem:[#allocation9 + $0x1c4] sm:$0xf] }
  0x82   :  { %v1616_v36 = vor.u32 %v1798_v34, %v1613_v35  ;;  %v1808_v35 = vld [vmem:[#allocation9 + $0x194] sm:$0xf] }
  0x83   :  { %1040 = vmatpush.bf16.msra.mxu0 %v1580_v31  ;;  %1056 = vmatpush.bf16.msra.mxu2 %v1660_v51 }
  0x84   :  { %1087 = vmatpush.bf16.msrb.mxu3 %v1576_v49  ;;  %1073 = vmatpush.bf16.msrb.mxu1 %v1480_v25  ;;  %v1621_v25 = vld [vmem:[#allocation9 + $0x158] sm:$0xf0] }
  0x85   :  { %v1624_v27 = vor.u32 %v1800_v22, %v1621_v25  ;;  %v171_v22 = vperm.slane %v2089_v59, 3 }
  0x87   :  { %1105 = vmatpush.bf16.msrb.mxu0 %v1640_v5 }
  0x88   :  { %1088 = vmatpush.bf16.msrb.mxu3 %v1568_v61  ;;  %1074 = vmatpush.bf16.msrb.mxu1 %v1472_v41  ;;  %v1536_v61 = vor.u32 %v1778_v55, %v1533_v56  ;;  %v1794_v56 = vld [vmem:[#allocation9 + $0x124] sm:$0xf] }
  0x8b   :  { %1106 = vmatpush.bf16.msrb.mxu0 %v1632_v14 }
  0x8c   :  { %1089 = vmatpush.bf16.msrb.mxu3 %v1560_v11  ;;  %1075 = vmatpush.bf16.msrb.mxu1 %v1464_v54 }
  0x8f   :  { %1107 = vmatpush.bf16.msrb.mxu0 %v1624_v27 }
  0x90   :  { %1090 = vmatpush.bf16.msrb.mxu3 %v1552_v26  ;;  %1076 = vmatpush.bf16.msrb.mxu1 %v1456_v6  ;;  %v1792_v6 = vld [vmem:[#allocation9 + $0x114] sm:$0xf] }
  0x91   :  { %v1592_v9 = vor.u32 %v1792_v6, %v1589_v7 }
  0x93   :  { %1108 = vmatpush.bf16.msrb.mxu0 %v1616_v36  ;;  %v1653_v36 = vld [vmem:[#allocation9 + $0x198] sm:$0xf0] }
  0x94   :  { %1091 = vmatpush.bf16.msrb.mxu3 %v1544_v42 }
  0x98   :  { %1092 = vmatpush.bf16.msrb.mxu3 %v1536_v61  ;;  %v1816_v61 = vld [vmem:[#allocation9 + $0x1d4] sm:$0xf] }
  0x9c   :  { %1093 = vmatpush.bf16.msrb.mxu3 %v1528_v19  ;;  %v1812_v19 = vld [vmem:[#allocation9 + $0x1b4] sm:$0xf] }
  0xb0   :  { %v2085_v48 = vpop.f32.mrf.mxu1 }
  0xb5   :  { %v2087_v58 = vpop.f32.mrf.mxu3 }
  0xb8   :  { %v472_v10 = vpop.f32.mrf.mxu1 }
  0xb9   :  { %v452_v13 = vpop.f32.mrf.mxu0 }
  0xba   :  { %v453_v30 = vadd.f32 %v452_v13, %v2092_v12 }
  0xbc   :  { %v471_v49 = vadd.f32 %v2085_v48, %v453_v30  ;;  %v1651_v48 = vld [vmem:[#allocation9 + $0x190] sm:$0xf] }
  0xbd   :  { %v2094_v24 = vpop.f32.mrf.mxu3  ;;  %v1652_v2 = vor.u32 %v1809_v63, %v1651_v48 }
  0xbe   :  { %v587_v0 = vmax.f32 %v471_v49, 0.0  ;;  %v1605_v49 = vld [vmem:[#allocation9 + $0x138] sm:$0xf0] }
  0xbf   :  { %1057 = vmatpush.bf16.msra.mxu2 %v1652_v2  ;;  %v1608_v51 = vor.u32 %v1796_v47, %v1605_v49 }
  0xc0   :  { %v488_v39 = vpop.f32.mrf.mxu2  ;;  %v2100_v40 = vpop.f32.mrf.mxu1 }
  0xc1   :  { %v454_v43 = vpop.f32.mrf.mxu0  ;;  %v489_v62 = vadd.f32 %v488_v39, %v2098_v38  ;;  %v1701_v39 = vld [vmem:[#allocation9 + $0x1f8] sm:$0xf0]  ;;  %1109 = vmatpush.bf16.msrb.mxu0 %v1608_v51 }
  0xc2   :  { %v455_v50 = vadd.f32 %v454_v43, %v2092_v12  ;;  %v2117_v43 = vperm.slane %v2089_v59, 2 }
  0xc3   :  { %v507_v16 = vadd.f32 %v2087_v58, %v489_v62  ;;  %v1517_v58 = vld [vmem:[#allocation9 + $0x88] sm:$0xf0]  ;;  %1058 = vmatpush.bf16.msra.mxu2 %v1644_v23  ;;  %v1685_v62 = vld [vmem:[#allocation9 + $0x1d8] sm:$0xf0] }
  0xc4   :  { %v473_v57 = vadd.f32 %v472_v10, %v455_v50  ;;  %v1520_v31 = vor.u32 %v1774_v28, %v1517_v58  ;;  %v1818_v50 = vld [vmem:[#allocation9 + $0x1e4] sm:$0xf]  ;;  %v1688_v63 = vor.u32 %v1816_v61, %v1685_v62 }
  0xc5   :  { %v2104_v60 = vpop.f32.mrf.mxu3  ;;  %v588_v32 = vmax.f32 %v507_v16, 0.0  ;;  %v1696_v46 = vor.u32 %v1818_v50, %v1693_v52 }
  0xc6   :  { %v591_v1 = vmax.f32 %v473_v57, 0.0  ;;  %1094 = vmatpush.bf16.msrb.mxu3 %v1520_v31  ;;  %v1661_v31 = vld [vmem:[#allocation9 + $0x1a8] sm:$0xf0] }
  0xc8   :  { %v2107_v10 = vpack.c.bf16 %v591_v1, %v587_v0  ;;  %v490_v11 = vpop.f32.mrf.mxu2  ;;  %v477_v13 = vpop.f32.mrf.mxu1 }
  0xc9   :  { %v491_v17 = vadd.f32 %v490_v11, %v2098_v38  ;;  %v457_v18 = vpop.f32.mrf.mxu0  ;;  %v1677_v11 = vld [vmem:[#allocation9 + $0x1c8] sm:$0xf0] }
  0xca   :  { %1005 = vmatmul.bf16.vlgmr.msra.gmra.mxu1 %v2107_v10  ;;  %v458_v29 = vadd.f32 %v457_v18, %v2092_v12  ;;  %v1581_v18 = vld [vmem:[#allocation9 + $0x108] sm:$0xf0] }
  0xcb   :  { %v509_v26 = vadd.f32 %v2094_v24, %v491_v17  ;;  %v1704_v24 = vor.u32 %v1820_v37, %v1701_v39  ;;  %v1790_v17 = vld [vmem:[#allocation9 + $0x104] sm:$0xf]  ;;  %v1656_v37 = vor.u32 %v1808_v35, %v1653_v36 }
  0xcc   :  { %v476_v44 = vadd.f32 %v2100_v40, %v458_v29  ;;  %v1597_v40 = vld [vmem:[#allocation9 + $0x128] sm:$0xf0]  ;;  %v1584_v20 = vor.u32 %v1790_v17, %v1581_v18  ;;  %v1806_v39 = vld [vmem:[#allocation9 + $0x184] sm:$0xf] }
  0xcd   :  { %v513_v30 = vpop.f32.mrf.mxu3  ;;  %v592_v33 = vmax.f32 %v509_v26, 0.0  ;;  %1123 = vmatpush.bf16.msrb.mxu2 %v1704_v24  ;;  %v1600_v57 = vor.u32 %v1794_v56, %v1597_v40  ;;  %v1672_v26 = vor.u32 %v1812_v19, %v1669_v21  ;;  %v1645_v24 = vld [vmem:[#allocation9 + $0x188] sm:$0xf0] }
  0xce   :  { %v595_v55 = vmax.f32 %v476_v44, 0.0  ;;  %v1810_v30 = vld [vmem:[#allocation9 + $0x1a4] sm:$0xf]  ;;  %v1648_v51 = vor.u32 %v1806_v39, %v1645_v24 }
  0xcf   :  { %v2114_v41 = vpack.c.bf16 %v592_v33, %v588_v32  ;;  %1110 = vmatpush.bf16.msrb.mxu0 %v1600_v57  ;;  %v1664_v32 = vor.u32 %v1810_v30, %v1661_v31 }
  0xd0   :  { %v493_v42 = vpop.f32.mrf.mxu2  ;;  %v524_v12 = vpop.f32.mrf.mxu1  ;;  %v2124_v3 = vpack.c.bf16 %v595_v55, %v595_v55 }
  0xd1   :  { %1023 = vmatmul.bf16.vlgmr.msra.gmra.mxu3 %v2114_v41  ;;  %v459_v45 = vpop.f32.mrf.mxu0  ;;  %v494_v53 = vadd.f32 %v493_v42, %v2098_v38  ;;  %v525_v54 = vadd.f32 %v524_v12, %v2117_v43  ;;  %1124 = vmatpush.bf16.msrb.mxu2 %v1696_v46 }
  0xd3   :  { %v512_v48 = vadd.f32 %v2104_v60, %v494_v53  ;;  %v1680_v60 = vor.u32 %v1814_v8, %v1677_v11  ;;  %1111 = vmatpush.bf16.msrb.mxu0 %v1592_v9 }
  0xd5   :  { %v542_v5 = vpop.f32.mrf.mxu3  ;;  %1125 = vmatpush.bf16.msrb.mxu2 %v1688_v63  ;;  %v596_v13 = vmax.f32 %v512_v48, 0.0 }
  0xd6   :  { %v543_v0 = vadd.f32 %v542_v5, %v525_v54 }
  0xd7   :  { %v604_v25 = vpack.c.bf16 %v596_v13, %v596_v13  ;;  %1112 = vmatpush.bf16.msrb.mxu0 %v1584_v20 }
  0xd8   :  { %v495_v1 = vpop.f32.mrf.mxu2  ;;  %v526_v2 = vpop.f32.mrf.mxu1  ;;  %v589_v14 = vmax.f32 %v543_v0, 0.0 }
  0xd9   :  { %v527_v38 = vadd.f32 %v526_v2, %v2117_v43  ;;  %v560_v4 = vpop.f32.mrf.mxu0  ;;  %1126 = vmatpush.bf16.msrb.mxu2 %v1680_v60 }
  0xda   :  { %1010 = vmatmul.bf16.gmra.mxu1 %v2124_v3  ;;  %v561_v33 = vadd.f32 %v560_v4, %v171_v22 }
  0xdd   :  { %v544_v15 = vpop.f32.mrf.mxu3  ;;  %1127 = vmatpush.bf16.msrb.mxu2 %v1672_v26 }
  0xde   :  { %v545_v16 = vadd.f32 %v544_v15, %v527_v38 }
  0xe0   :  { %v593_v23 = vmax.f32 %v545_v16, 0.0  ;;  %v578_v27 = vpop.f32.mrf.mxu2  ;;  %v529_v28 = vpop.f32.mrf.mxu1 }
  0xe1   :  { %1028 = vmatmul.bf16.gmra.mxu3 %v604_v25  ;;  %v562_v29 = vpop.f32.mrf.mxu0  ;;  %v530_v34 = vadd.f32 %v529_v28, %v2117_v43  ;;  %1128 = vmatpush.bf16.msrb.mxu2 %v1664_v32  ;;  %v579_v42 = vadd.f32 %v578_v27, %v561_v33 }
  0xe2   :  { %v601_v58 = vpack.c.bf16 %v593_v23, %v589_v14  ;;  %v563_v12 = vadd.f32 %v562_v29, %v171_v22  ;;  %v671_v14 = vld [vmem:[%s2143_s4] sm:$0x3]  ;;  %s2000_s4 = smov [#allocation12]  }
  0xe3   :  { %v590_v52 = vmax.f32 %v579_v42, 0.0  ;;  %v673_v17 = vperm.slane %v671_v14, 0  ;;  %s1219_s28 = sshll.u32 %s2000_s4, 4  ;;  %s1220_s28 = int_to_ptr.vmem [resolvable:$true] %s1219_s28 }
  0xe4   :  { %1041 = vmatmul.bf16.vlgmr.msra.gmra.mxu0 %v601_v58 }
  0xe5   :  { %v547_v59 = vpop.f32.mrf.mxu3  ;;  %1129 = vmatpush.bf16.msrb.mxu2 %v1656_v37 }
  0xe6   :  { %v548_v44 = vadd.f32 %v547_v59, %v530_v34 }
  0xe8   :  { %v580_v45 = vpop.f32.mrf.mxu2  ;;  %v531_v47 = vpop.f32.mrf.mxu1  ;;  %v597_v53 = vmax.f32 %v548_v44, 0.0 }
  0xe9   :  { %v581_v49 = vadd.f32 %v580_v45, %v563_v12  ;;  %v565_v50 = vpop.f32.mrf.mxu0  ;;  %1130 = vmatpush.bf16.msrb.mxu2 %v1648_v51  ;;  %v1147_v45 = vld [vmem:[#allocation11] sm:$0xff] }
  0xea   :  { %1077 = vmatmul.bf16.vlgmr.msrb.gmra.mxu1 %v2107_v10  ;;  %v566_v5 = vadd.f32 %v565_v50, %v171_v22  ;;  %v605_v55 = vpack.c.bf16 %v597_v53, %v597_v53 }
  0xeb   :  { %v594_v43 = vmax.f32 %v581_v49, 0.0  ;;  %v1153_v49 = vunpack.c.l.b16 %v1147_v45 }
  0xed   :  { %v549_v46 = vpop.f32.mrf.mxu3  ;;  %v602_v54 = vpack.c.bf16 %v594_v43, %v590_v52  ;;  %v1155_v50 = vpack.c.b16 %v1153_v49, %v1153_v49  ;;  %v1185_v52 = vld [vmem:[#allocation2] sm:$0x1]  ;;  %v1999_v43 = vmov 0  }
  0xee   :  { %1833 = vset.pattern.permute.xlu0 %v1999_v43  ;;  %v674_v46 = vperm.slane %v671_v14, 1 }
  0xef   :  { %1059 = vmatmul.bf16.vlgmr.msra.gmra.mxu2 %v602_v54  ;;  %1188 = vperm.xlu0 %1833, %v1185_v52  }
  0xf0   :  { %v583_v56 = vpop.f32.mrf.mxu2 }
  0xf1   :  { %1095 = vmatmul.bf16.vlgmr.msrb.gmra.mxu3 %v2114_v41  ;;  %v567_v40 = vpop.f32.mrf.mxu0  ;;  %v584_v57 = vadd.f32 %v583_v56, %v566_v5 }
  0xf3   :  { %v598_v61 = vmax.f32 %v584_v57, 0.0 }
  0xf4   :  { %1046 = vmatmul.bf16.gmra.mxu0 %v605_v55 }
  0xf5   :  { %v606_v10 = vpack.c.bf16 %v598_v61, %v598_v61 }
  0xf8   :  { %v585_v62 = vpop.f32.mrf.mxu2 }
  0xfa   :  { %1082 = vmatmul.bf16.gmra.mxu1 %v2124_v3 }
  0xff   :  { %1064 = vmatmul.bf16.gmra.mxu2 %v606_v10 }
 0x101   :  { %1100 = vmatmul.bf16.gmra.mxu3 %v604_v25 }
 0x104   :  { %1113 = vmatmul.bf16.vlgmr.msrb.gmra.mxu0 %v601_v58 }
 0x10f   :  { %1131 = vmatmul.bf16.vlgmr.msrb.gmra.mxu2 %v602_v54 }
 0x114   :  { %1118 = vmatmul.bf16.gmra.mxu0 %v605_v55 }
 0x11f   :  { %1136 = vmatmul.bf16.gmra.mxu2 %v606_v10 }
 0x147   :  { %v1006_v48 = vpop.f32.mrf.mxu1 }
 0x148   :  { %v1007_v27 = vadd.f32 %v1006_v48, %v673_v17 }
 0x14f   :  { %v1008_v63 = vpop.f32.mrf.mxu1 }
 0x150   :  { %v1009_v23 = vadd.f32 %v1008_v63, %v673_v17 }
 0x154   :  { %v1024_v0 = vpop.f32.mrf.mxu3 }
 0x155   :  { %v1025_v30 = vadd.f32 %v1024_v0, %v1007_v27 }
 0x157   :  { %v1011_v1 = vpop.f32.mrf.mxu1 }
 0x158   :  { %v1012_v19 = vadd.f32 %v1011_v1, %v673_v17 }
 0x15c   :  { %v1026_v2 = vpop.f32.mrf.mxu3 }
 0x15d   :  { %v1027_v28 = vadd.f32 %v1026_v2, %v1009_v23 }
 0x15f   :  { %v1013_v41 = vpop.f32.mrf.mxu1 }
 0x161   :  { %v1042_v38 = vpop.f32.mrf.mxu0 }
 0x162   :  { %v1043_v33 = vadd.f32 %v1042_v38, %v1025_v30 }
 0x164   :  { %v1029_v4 = vpop.f32.mrf.mxu3 }
 0x165   :  { %v1030_v20 = vadd.f32 %v1029_v4, %v1012_v19 }
 0x167   :  { %v1078_v6 = vpop.f32.mrf.mxu1 }
 0x168   :  { %v1079_v57 = vadd.f32 %v1078_v6, %v674_v46 }
 0x169   :  { %v1044_v7 = vpop.f32.mrf.mxu0 }
 0x16a   :  { %v1045_v31 = vadd.f32 %v1044_v7, %v1027_v28 }
 0x16c   :  { %v1031_v8 = vpop.f32.mrf.mxu3 }
 0x16f   :  { %v1080_v9 = vpop.f32.mrf.mxu1 }
 0x170   :  { %v1081_v55 = vadd.f32 %v1080_v9, %v674_v46 }
 0x171   :  { %v1047_v3 = vpop.f32.mrf.mxu0 }
 0x172   :  { %v1060_v11 = vpop.f32.mrf.mxu2  ;;  %v1048_v25 = vadd.f32 %v1047_v3, %v1030_v20  ;;  %v1154_v3 = vunpack.c.h.b16 %v1147_v45 }
 0x173   :  { %v1061_v59 = vadd.f32 %v1060_v11, %v1043_v33 }
 0x174   :  { %v1096_v13 = vpop.f32.mrf.mxu3  ;;  %v1156_v9 = vpack.c.b16 %v1154_v3, %v1154_v3 }
 0x175   :  { %v1141_v42 = vmax.f32 %v1061_v59, 0.0  ;;  %v1097_v10 = vadd.f32 %v1096_v13, %v1079_v57 }
 0x177   :  { %v1083_v60 = vpop.f32.mrf.mxu1 }
 0x178   :  { %v1084_v54 = vadd.f32 %v1083_v60, %v674_v46  ;;  %v1189_v60 = vpop.permute.xlu0 %1188 }
 0x179   :  { %v1049_v15 = vpop.f32.mrf.mxu0  ;;  %v1191_v14 = vperm.slane %v1189_v60, 0 }
 0x17a   :  { %v1062_v16 = vpop.f32.mrf.mxu2 }
 0x17b   :  { %v1063_v34 = vadd.f32 %v1062_v16, %v1045_v31 }
 0x17c   :  { %v1098_v18 = vpop.f32.mrf.mxu3 }
 0x17d   :  { %v1143_v39 = vmax.f32 %v1063_v34, 0.0  ;;  %v1099_v61 = vadd.f32 %v1098_v18, %v1081_v55 }
 0x17f   :  { %v1085_v21 = vpop.f32.mrf.mxu1  ;;  %v1148_v12 = vpack.c.bf16 %v1143_v39, %v1141_v42 }
 0x181   :  { %v1114_v22 = vpop.f32.mrf.mxu0 }
 0x182   :  { %v1065_v26 = vpop.f32.mrf.mxu2  ;;  %v1115_v0 = vadd.f32 %v1114_v22, %v1097_v10 }
 0x183   :  { %v1066_v58 = vadd.f32 %v1065_v26, %v1048_v25 }
 0x184   :  { %v1101_v29 = vpop.f32.mrf.mxu3 }
 0x185   :  { %v1145_v32 = vmax.f32 %v1066_v58, 0.0  ;;  %v1102_v5 = vadd.f32 %v1101_v29, %v1084_v54 }
 0x187   :  { %v1150_v35 = vpack.c.bf16 %v1145_v32, %v1145_v32 }
 0x189   :  { %v1116_v36 = vpop.f32.mrf.mxu0  ;;  %1165 = vmatpush.bf16.xpose.msra.mxu1 %v1150_v35 }
 0x18a   :  { %v1067_v37 = vpop.f32.mrf.mxu2  ;;  %v1117_v48 = vadd.f32 %v1116_v36, %v1099_v61 }
 0x18c   :  { %v1103_v24 = vpop.f32.mrf.mxu3 }
 0x191   :  { %v1119_v44 = vpop.f32.mrf.mxu0  ;;  %1166 = vmatpush.bf16.xpose.msra.mxu1 %v1148_v12 }
 0x192   :  { %v1132_v47 = vpop.f32.mrf.mxu2  ;;  %v1120_v56 = vadd.f32 %v1119_v44, %v1102_v5 }
 0x193   :  { %v1133_v41 = vadd.f32 %v1132_v47, %v1115_v0 }
 0x195   :  { %v1142_v7 = vmax.f32 %v1133_v41, 0.0 }
 0x198   :  { %1167 = vmatmul.bf16.vlgmr.msra.gmra.mxu1 %v1155_v50 }
 0x199   :  { %v1121_v51 = vpop.f32.mrf.mxu0 }
 0x19a   :  { %v1134_v53 = vpop.f32.mrf.mxu2 }
 0x19b   :  { %v1135_v1 = vadd.f32 %v1134_v53, %v1117_v48 }
 0x19d   :  { %v1144_v4 = vmax.f32 %v1135_v1, 0.0 }
 0x19f   :  { %v1149_v8 = vpack.c.bf16 %v1144_v4, %v1142_v7 }
 0x1a2   :  { %v1137_v40 = vpop.f32.mrf.mxu2 }
 0x1a3   :  { %v1138_v62 = vadd.f32 %v1137_v40, %v1120_v56 }
 0x1a5   :  { %v1146_v63 = vmax.f32 %v1138_v62, 0.0 }
 0x1a7   :  { %v1151_v2 = vpack.c.bf16 %v1146_v63, %v1146_v63 }
 0x1a9   :  { %1178 = vmatpush.bf16.xpose.msra.mxu3 %v1151_v2 }
 0x1aa   :  { %v1139_v38 = vpop.f32.mrf.mxu2 }
 0x1b1   :  { %1179 = vmatpush.bf16.xpose.msra.mxu3 %v1149_v8 }
 0x1b8   :  { %1180 = vmatmul.bf16.vlgmr.msra.gmra.mxu3 %v1156_v9 }
 0x215   :  { %v1168_v11 = vpop.f32.mrf.mxu1 }
 0x21d   :  { %v1170_v6 = vpop.f32.mrf.mxu1 }
 0x23b   :  { %v1181_v13 = vpop.f32.mrf.mxu3 }
 0x23c   :  { %v1182_v15 = vadd.f32 %v1181_v13, %v1168_v11 }
 0x23e   :  { %v1192_v16 = vadd.f32 %v1191_v14, %v1182_v15 }
 0x240   :  { %v1705_v17 = vmul.f32 -1.442695, %v1192_v16 }
 0x242   :  { %1834 = vpow2.f32 %v1705_v17 }
 0x243   :  { %v1183_v18 = vpop.f32.mrf.mxu3 }
 0x248   :  { %v1835_v19 = vpop.eup %1834 }
 0x249   :  { %v1196_v20 = vadd.f32 1.0, %v1835_v19 }
 0x24b   :  { %1836 = vrcp.f32 %v1196_v20  ;;  %v1208_v25 = vand.u32 2147483648, %v1196_v20  ;;  %v1206_v27 = vand.u32 2147483647, %v1196_v20  ;;  %vm1202_vm2 = vweird.f32 %v1196_v20 }
 0x24d   :  { %v1209_v58 = vor.u32 1.1754944e-38, %v1208_v25  ;;  %vm1207_vm5 = vcmp.eq.f32.partialorder %v1206_v27, 8.507059e+37 }
 0x251   :  { %v1837_v21 = vpop.eup %1836 }
 0x252   :  { %v1198_v22 = vmul.f32 %v1837_v21, %v1196_v20  ;;  %vm1203_vm1 = vweird.f32 %v1837_v21 }
 0x253   :  { %vm1204_vm3 = vmor %vm1202_vm2, %vm1203_vm1 }
 0x254   :  { %v1199_v23 = vsub.f32 1.0, %v1198_v22 }
 0x256   :  { %v1200_v26 = vmul.f32 %v1837_v21, %v1199_v23 }
 0x258   :  { %v1201_v28 = vadd.f32 %v1837_v21, %v1200_v26 }
 0x25a   :  { %v1205_v29 = vsel %vm1204_vm3, %v1837_v21, %v1201_v28 }
 0x25b   :  { %v1210_v30 = vsel %vm1207_vm5, %v1209_v58, %v1205_v29 }
 0x25c   :  { %1213 = vst.msk [vmem:[#allocation12] sm:$0x1] %vm1212_vm4, %v1210_v30 }
 0x25d   :  { %1224 = dma.vmem_to_hbm [thread:$0]  %s1220_s28, 16, %s1222_s8, [#allocation5]  }
 0x25e   :  { %1988 = dma.done.wait [#allocation5], 16  }
 0x25f   :  { %1989 = vsyncadd [#allocation5], 4294967280 }
 0x260   :  { %1229 = vsyncpa [#allocation4], 1 }
 0x261   :  { %1230 = vsyncpa [#allocation7], 1 }
 0x262   :  { %1231 = vsyncpa [#allocation10], 1 }
 0x263   :  { %1232 = vsyncpa [#allocation5], 1 }

</bundles_post_ra>
